<compile_context>
chip_gen: v7x
topology: tpu7x:2x2x1
jax: 0.10.0
libtpu: 0.0.40
codegen_flags: <defaults>
</compile_context>

<pallas_src>
import functools

import jax
import jax.numpy as jnp
from jax import lax
from jax.experimental import pallas as pl
from jax.experimental.pallas import tpu as pltpu

IN = 3    # fc1 input features
H1 = 20   # fc1 output features
NC = 2    # number of classes


def _round_up(n, m):
    return pl.cdiv(n, m) * m


def _ann_net_kernel(x_ref, w1_ref, b1_ref, w2_ref, b2_ref, o_ref, *, chunk):
    # Weights/biases are tiny and VMEM-resident (constant index_map).  Load and
    # broadcast ONCE per grid step -- JAX does not CSE broadcast_in_dim, so these
    # must stay out of the per-chunk loop.
    w1 = w1_ref[...]                                    # (H1, IN)
    w2 = w2_ref[...]                                    # (NC, H1)
    b1b = jnp.broadcast_to(b1_ref[...], (H1, chunk))    # (H1, chunk)
    b2b = jnp.broadcast_to(b2_ref[...], (NC, chunk))    # (NC, chunk)
    n_chunks = x_ref.shape[1] // chunk                  # static Python int

    def body(c, carry):
        j = pl.multiple_of(c * chunk, chunk)
        xc = x_ref[:, pl.ds(j, chunk)]                  # (IN, chunk), batch on lanes

        # fc1 on the MXU (f32 operands, f32 accumulation), bias + ReLU on the VPU.
        h = jnp.dot(w1, xc, preferred_element_type=jnp.float32) + b1b   # (H1, chunk)
        h = jnp.maximum(h, 0.0)

        # fc2 on the MXU.
        logits = jnp.dot(w2, h, preferred_element_type=jnp.float32) + b2b  # (NC, chunk)

        # 2-class log_softmax with no cross-lane reduction (classes on sublanes):
        # lse = max(l0,l1) + log(1 + exp(-|l0-l1|))  -> one exp + one log per sample.
        l0 = logits[0:1, :]
        l1 = logits[1:2, :]
        m = jnp.maximum(l0, l1)
        lse = m + jnp.log(1.0 + jnp.exp(-jnp.abs(l0 - l1)))   # (1, chunk)

        # Single lane-dense store; lse broadcasts over the 2 class sublanes.
        o_ref[:, pl.ds(j, chunk)] = (logits - lse).astype(o_ref.dtype)
        return carry

    lax.fori_loop(0, n_chunks, body, 0, unroll=True)


def ann_net_forward_lanes(xT, w1, b1, w2, b2, *, max_block_b=16384, chunk=512):
    """Lane-dense contract: xT is (3, Bp) with Bp a multiple of 128; returns (2, Bp)
    log-probs.  Preferred entry point: no wrapper-side transpose/pad HBM passes."""
    in_f, Bp = xT.shape
    assert in_f == IN and Bp % 128 == 0

    # Chunk = lanes processed per inner-loop iteration (bounds vreg pressure).
    chunk = min(chunk, Bp)
    if Bp % chunk:
        chunk = 128                      # 128 always divides Bp
    assert chunk % 128 == 0

    # Block = lanes per grid step.  Aim for >= 2 grid steps when there is more than
    # one chunk of work (v7x has 2 TensorCores), capped by max_block_b for VMEM.
    n_total = Bp // chunk
    cpb = 1 if n_total <= 1 else min(max(1, max_block_b // chunk),
                                     pl.cdiv(n_total, 2))
    while n_total % cpb:                 # make block_b divide Bp exactly (no padding)
        cpb -= 1
    block_b = cpb * chunk
    assert block_b % 128 == 0 and Bp % block_b == 0

    w1c = jnp.asarray(w1, jnp.float32)
    b1c = jnp.asarray(b1, jnp.float32).reshape(H1, 1)
    w2c = jnp.asarray(w2, jnp.float32)
    b2c = jnp.asarray(b2, jnp.float32).reshape(NC, 1)

    cost = pl.CostEstimate(
        flops=2 * (IN * H1 + H1 * NC) * Bp,
        transcendentals=2 * Bp,                      # 1 exp + 1 log per sample
        bytes_accessed=(IN + NC) * 4 * Bp + 4 * (H1 * IN + H1 + NC * H1 + NC),
    )

    kernel = functools.partial(_ann_net_kernel, chunk=chunk)
    return pl.pallas_call(
        kernel,
        out_shape=jax.ShapeDtypeStruct((NC, Bp), jnp.float32),
        grid=(Bp // block_b,),
        in_specs=[
            pl.BlockSpec((IN, block_b), lambda i: (0, i)),   # x^T tile, batch on lanes
            pl.BlockSpec((H1, IN), lambda i: (0, 0)),        # weights/biases: constant
            pl.BlockSpec((H1, 1), lambda i: (0, 0)),         #   index_map -> VMEM-resident
            pl.BlockSpec((NC, H1), lambda i: (0, 0)),
            pl.BlockSpec((NC, 1), lambda i: (0, 0)),
        ],
        out_specs=pl.BlockSpec((NC, block_b), lambda i: (0, i)),
        compiler_params=pltpu.CompilerParams(
            dimension_semantics=("parallel",),               # shard batch tiles across TCs
        ),
        cost_estimate=cost,
    )(xT, w1c, b1c, w2c, b2c)


def ann_net_forward(x, w1, b1, w2, b2, *, max_block_b=16384, chunk=512):
    """PyTorch-layout wrapper.  x: (B, 3); w1: (20, 3); b1: (20,); w2: (2, 20); b2: (2,).
    Returns (B, 2) log-probs."""
    B = x.shape[0]
    chunk = min(chunk, _round_up(B, 128))     # don't over-pad tiny batches
    b_pad = _round_up(B, chunk)

    # One pad+transpose pass to the lane-dense (features, batch) layout.
    # TODO(synk): callers that can provide (3, B) / consume (2, B) directly should use
    # ann_net_forward_lanes and skip these two extra HBM passes.
    xT = jnp.zeros((IN, b_pad), jnp.float32).at[:, :B].set(
        jnp.asarray(x, jnp.float32).T)

    out_t = ann_net_forward_lanes(xT, w1, b1, w2, b2,
                                  max_block_b=max_block_b, chunk=chunk)
    return out_t[:, :B].T


def init_params(key):
    # Deterministic init mimicking nn.Linear's U(-1/sqrt(fan_in), 1/sqrt(fan_in)),
    # PyTorch weight layout (out_features, in_features).
    k1, k2, k3, k4 = jax.random.split(key, 4)
    bound1 = 1.0 / jnp.sqrt(3.0)
    bound2 = 1.0 / jnp.sqrt(20.0)
    w1 = jax.random.uniform(k1, (H1, IN), jnp.float32, -bound1, bound1)
    b1 = jax.random.uniform(k2, (H1,), jnp.float32, -bound1, bound1)
    w2 = jax.random.uniform(k3, (NC, H1), jnp.float32, -bound2, bound2)
    b2 = jax.random.uniform(k4, (NC,), jnp.float32, -bound2, bound2)
    return w1, b1, w2, b2


if __name__ == "__main__":
    key = jax.random.PRNGKey(0)
    kx, kp = jax.random.split(key)
    B = 8
    x = jax.random.normal(kx, (B, IN), jnp.float32)
    w1, b1, w2, b2 = init_params(kp)

    out = ann_net_forward(x, w1, b1, w2, b2)
    out = jax.block_until_ready(out)

    # Pure-JAX reference (PyTorch semantics: y = x @ W.T + b), highest-precision
    # matmuls so the comparison isn't polluted by XLA's default bf16 dot passes.
    hp = jax.lax.Precision.HIGHEST
    h = jnp.maximum(jnp.dot(x, w1.T, precision=hp) + b1[None, :], 0.0)
    logits = jnp.dot(h, w2.T, precision=hp) + b2[None, :]
    ref = jax.nn.log_softmax(logits, axis=1)

    assert out.shape == (B, NC)
    max_err = float(jnp.max(jnp.abs(out - ref)))
    assert jnp.allclose(out, ref, atol=1e-4, rtol=1e-4), max_err

    print("KERNEL_OK")
</pallas_src>

<mosaic_0001>
module attributes {stable_mosaic.version = 11 : i64} {
  func.func @_ann_net_kernel(%arg0: i32, %arg1: memref<3x128xf32, #tpu.memory_space<vmem>>, %arg2: memref<20x3xf32, #tpu.memory_space<vmem>>, %arg3: memref<20x1xf32, #tpu.memory_space<vmem>>, %arg4: memref<2x20xf32, #tpu.memory_space<vmem>>, %arg5: memref<2x1xf32, #tpu.memory_space<vmem>>, %arg6: memref<2x128xf32, #tpu.memory_space<vmem>>) attributes {dimension_semantics = [#tpu.dimension_semantics<parallel>], iteration_bounds = array<i64: 1>, scalar_prefetch = 0 : i64, scratch_operands = 0 : i64, tpu.core_type = #tpu.core_type<tc>, window_params = [{transform_indices = @transform_0, window_bounds = array<i64: 3, 128>}, {pipeline_mode = #tpu.pipeline_mode<synchronous>, transform_indices = @transform_1, window_bounds = array<i64: 20, 3>}, {pipeline_mode = #tpu.pipeline_mode<synchronous>, transform_indices = @transform_2, window_bounds = array<i64: 20, 1>}, {pipeline_mode = #tpu.pipeline_mode<synchronous>, transform_indices = @transform_3, window_bounds = array<i64: 2, 20>}, {pipeline_mode = #tpu.pipeline_mode<synchronous>, transform_indices = @transform_4, window_bounds = array<i64: 2, 1>}, {transform_indices = @transform_5, window_bounds = array<i64: 2, 128>}]} {
    %c0 = arith.constant 0 : index
    %c0_0 = arith.constant 0 : index
    %0 = vector.load %arg2[%c0, %c0_0] : memref<20x3xf32, #tpu.memory_space<vmem>>, vector<20x3xf32>
    %c0_1 = arith.constant 0 : index
    %c0_2 = arith.constant 0 : index
    %1 = vector.load %arg4[%c0_1, %c0_2] : memref<2x20xf32, #tpu.memory_space<vmem>>, vector<2x20xf32>
    %c0_3 = arith.constant 0 : index
    %c0_4 = arith.constant 0 : index
    %2 = vector.load %arg3[%c0_3, %c0_4] : memref<20x1xf32, #tpu.memory_space<vmem>>, vector<20x1xf32>
    %3 = vector.shape_cast %2 : vector<20x1xf32> to vector<20x1xf32>
    %4 = vector.broadcast %3 : vector<20x1xf32> to vector<20x128xf32>
    %c0_5 = arith.constant 0 : index
    %c0_6 = arith.constant 0 : index
    %5 = vector.load %arg5[%c0_5, %c0_6] : memref<2x1xf32, #tpu.memory_space<vmem>>, vector<2x1xf32>
    %6 = vector.shape_cast %5 : vector<2x1xf32> to vector<2x1xf32>
    %7 = vector.broadcast %6 : vector<2x1xf32> to vector<2x128xf32>
    %c0_i32 = arith.constant 0 : i32
    %c128_i32 = arith.constant 128 : i32
    %8 = arith.muli %c0_i32, %c128_i32 : i32
    %9 = tpu.assume_multiple %8, 128 : i32
    %c0_7 = arith.constant 0 : index
    %10 = arith.index_cast %9 : i32 to index
    %11 = vector.load %arg1[%c0_7, %10] : memref<3x128xf32, #tpu.memory_space<vmem>>, vector<3x128xf32>
    %cst = arith.constant dense<0.000000e+00> : vector<20x128xf32>
    %12 = tpu.matmul %0, %11, %cst {dimension_numbers = #tpu.dot_dimension_numbers<[1], [0], [0], [1], [0, 0, 1, 1], [], []>} : vector<20x3xf32>, vector<3x128xf32>, vector<20x128xf32> -> vector<20x128xf32>
    %13 = arith.addf %12, %4 : vector<20x128xf32>
    %cst_8 = arith.constant 0.000000e+00 : f32
    %14 = vector.broadcast %cst_8 : f32 to vector<20x128xf32>
    %15 = arith.maximumf %13, %14 : vector<20x128xf32>
    %cst_9 = arith.constant dense<0.000000e+00> : vector<2x128xf32>
    %16 = tpu.matmul %1, %15, %cst_9 {dimension_numbers = #tpu.dot_dimension_numbers<[1], [0], [0], [1], [0, 0, 1, 1], [], []>} : vector<2x20xf32>, vector<20x128xf32>, vector<2x128xf32> -> vector<2x128xf32>
    %17 = arith.addf %16, %7 : vector<2x128xf32>
    %18 = vector.extract_strided_slice %17 {offsets = [0, 0], sizes = [1, 128], strides = [1, 1]} : vector<2x128xf32> to vector<1x128xf32>
    %19 = vector.extract_strided_slice %17 {offsets = [1, 0], sizes = [1, 128], strides = [1, 1]} : vector<2x128xf32> to vector<1x128xf32>
    %20 = arith.maximumf %18, %19 : vector<1x128xf32>
    %21 = arith.subf %18, %19 : vector<1x128xf32>
    %22 = math.absf %21 : vector<1x128xf32>
    %cst_10 = arith.constant 0.000000e+00 : f32
    %23 = vector.broadcast %cst_10 : f32 to vector<1x128xf32>
    %24 = arith.subf %23, %22 : vector<1x128xf32>
    %25 = math.exp %24 : vector<1x128xf32>
    %cst_11 = arith.constant 1.000000e+00 : f32
    %26 = vector.broadcast %cst_11 : f32 to vector<1x128xf32>
    %27 = arith.addf %26, %25 : vector<1x128xf32>
    %28 = math.log %27 : vector<1x128xf32>
    %29 = arith.addf %20, %28 : vector<1x128xf32>
    %30 = vector.broadcast %29 : vector<1x128xf32> to vector<2x128xf32>
    %31 = arith.subf %17, %30 : vector<2x128xf32>
    %c0_12 = arith.constant 0 : index
    %32 = arith.index_cast %9 : i32 to index
    %33 = vector.load %arg6[%c0_12, %32] : memref<2x128xf32, #tpu.memory_space<vmem>>, vector<2x128xf32>
    tpu.vector_store %arg6[%c0_12, %32], %31 {strides = array<i32>} : memref<2x128xf32, #tpu.memory_space<vmem>>, vector<2x128xf32>,
    %c1_i32 = arith.constant 1 : i32
    return
  }
  func.func @transform_0(%arg0: i32) -> (i32, i32) {
    %c0_i32 = arith.constant 0 : i32
    %c0_i32_0 = arith.constant 0 : i32
    return %c0_i32, %arg0 : i32, i32
  }
  func.func @transform_1(%arg0: i32) -> (i32, i32) {
    %c0_i32 = arith.constant 0 : i32
    %c0_i32_0 = arith.constant 0 : i32
    %c0_i32_1 = arith.constant 0 : i32
    return %c0_i32, %c0_i32_0 : i32, i32
  }
  func.func @transform_2(%arg0: i32) -> (i32, i32) {
    %c0_i32 = arith.constant 0 : i32
    %c0_i32_0 = arith.constant 0 : i32
    %c0_i32_1 = arith.constant 0 : i32
    return %c0_i32, %c0_i32_0 : i32, i32
  }
  func.func @transform_3(%arg0: i32) -> (i32, i32) {
    %c0_i32 = arith.constant 0 : i32
    %c0_i32_0 = arith.constant 0 : i32
    %c0_i32_1 = arith.constant 0 : i32
    return %c0_i32, %c0_i32_0 : i32, i32
  }
  func.func @transform_4(%arg0: i32) -> (i32, i32) {
    %c0_i32 = arith.constant 0 : i32
    %c0_i32_0 = arith.constant 0 : i32
    %c0_i32_1 = arith.constant 0 : i32
    return %c0_i32, %c0_i32_0 : i32, i32
  }
  func.func @transform_5(%arg0: i32) -> (i32, i32) {
    %c0_i32 = arith.constant 0 : i32
    %c0_i32_0 = arith.constant 0 : i32
    return %c0_i32, %arg0 : i32, i32
  }
}

</mosaic_0001>

<bundles_post_ra>
// kernel: tpu_custom_call.1
= control target key start
LH: loop header
LB: loop body
LE: loop exit
PB: predicated region body
PF: predicated region fallthrough
CT: control target
= control target key end

     0   :  { %vm60_vm0 = vcmask 1042432   ;;  %v330_v2 = vmov 0.0   ;;  %vm331_vm1 = vmmov 0   ;;  %vm50_vm2 = vcmask 23552   ;;  %s411_s0 = inlined_call_operand.vmem [shape: f32[3,128], index: 0, kind: input, shape index: {}]   ;;  %s412_s1 = inlined_call_operand.vmem [shape: f32[20,3], index: 1, kind: input, shape index: {}]   ;;  %s413_s2 = inlined_call_operand.vmem [shape: f32[20,1], index: 2, kind: input, shape index: {}]   ;;  %s414_s3 = inlined_call_operand.vmem [shape: f32[2,20], index: 3, kind: input, shape index: {}]   ;;  %s415_s4 = inlined_call_operand.vmem [shape: f32[2,1], index: 4, kind: input, shape index: {}]   ;;  %s416_s5 = inlined_call_operand.hbm [shape: f32[2,128], index: 5, kind: output, shape index: {}]  }
   0x1   :  { %v49_v0 = vld [vmem:[%s411_s0] sm:$0x7]  ;;  %272 = vmatprep.subr.mxu0 %v330_v2  ;;  %274 = vmatprep.mubr.msk.f32.mxu0 %vm331_vm1, %v330_v2  ;;  %v332_v4 = vmov 0   ;;  %v27_v5 = vld [vmem:[%s413_s2 + $0x10] sm:$0xf] }
   0x2   :  { %v21_v1 = vld [vmem:[%s412_s1] sm:$0xff]  ;;  %273 = vmatpush3.msk.msra.mxu0 %vm60_vm0, %v49_v0  ;;  %300 = vset.pattern.permute.xlu0 %v332_v4 }
   0x3   :  { %v25_v3 = vld [vmem:[%s413_s2] sm:$0xff]  ;;  %275 = vmatmul.mubr.msk.f32.vlgmr.msra.gmra.mrb[0].mxu0 %vm50_vm2, %v21_v1 }
   0x4   :  { %30 = vperm.xlu0 %300, %v25_v3  }
   0x5   :  { %10 = vsyncpa [#allocation3], 0  ;;  %277 = vmatprep.mubr.msk.f32.mxu0 %vm331_vm1, %v330_v2  ;;  %v22_v6 = vld [vmem:[%s412_s1 + $0x8] sm:$0xff]  ;;  %301 = vset.pattern.permute.xlu1 %v332_v4  ;;  %v43_v8 = vld [vmem:[%s415_s4] sm:$0x3]  ;;  %v333_v10 = vmov 0.0|0.0   ;;  %v238_v39 = vlaneseq }
   0x6   :  { %v26_v7 = vld [vmem:[%s413_s2 + $0x8] sm:$0xff]  ;;  %40 = vperm.xlu1 %301, %v27_v5   ;;  %289 = vmatprep.mubr.msk.f32.mxu1 %vm331_vm1, %v330_v2  ;;  %v23_v9 = vld [vmem:[%s412_s1 + $0x10] sm:$0xf]  ;;  %vm151_vm3 = vcmask 1043456   ;;  %v24_v27 = vld [vmem:[%s414_s3] sm:$0x3] }
   0x7   :  { %278 = vmatmul.mubr.msk.f32.gmra.mrb[2].mxu0 %vm50_vm2, %v22_v6  ;;  %292 = vmatprep.subr.bf16.mxu1 %v333_v10  ;;  %vm147_vm4 = vcmask 162816   ;;  %v239_v40 = vshrl.u32 %v238_v39, 7  ;;  %s334_s3 = smov [#allocation2]  }
   0x8   :  { %35 = vperm.xlu0 %300, %v26_v7   ;;  %280 = vmatprep.mubr.msk.f32.mxu0 %vm331_vm1, %v330_v2  ;;  %s250_s4 = sshll.u32 %s334_s3, 4  ;;  %s251_s4 = int_to_ptr.vmem [resolvable:$true] %s250_s4 }
   0x9   :  { %v240_v44 = vsub.s32 0, %v239_v40  ;;  %s306_s8 = scalar_lea.vmem %s251_s4, 32  ;;  %p311_p1 = scmp.lt.s32.totalorder %s251_s4, %s251_s4 }
   0xa   :  { %46 = vperm.xlu1 %301, %v43_v8   ;;  %p307_p0 = scmp.ne.s32.totalorder %s251_s4, %s306_s8  ;;  %p312_p2 = scmp.lt.s32.totalorder %s306_s8, %s306_s8 }
   0xb   :  { %281 = vmatmul.mubr.msk.f32.gmra.mrb[4].mxu0 %vm50_vm2, %v23_v9 }
   0xc   :  { %p313_p3 = por %p312_p2, %p311_p1 }
   0xe   :  { %p314_p4 = pnand %p313_p3, %p307_p0 }
  0x83   :  { %v31_v11 = vpop.permute.xlu0 %30 }
  0x85   :  { %v41_v21 = vpop.permute.xlu1 %40 }
  0x87   :  { %v36_v15 = vpop.permute.xlu0 %35 }
  0x89   :  { %v47_v28 = vpop.permute.xlu1 %46 }
  0xd6   :  { %v130_v12 = vpop.f32.mrb[0].mxu0 }
  0xd7   :  { %v276_v13 = vpop.f32.mrb[1].mxu0  ;;  %v131_v14 = vadd.f32 %v130_v12, %v31_v11 }
  0xd9   :  { %v144_v19 = vmax.f32 %v131_v14, 0.0 }
  0xda   :  { %v135_v16 = vpop.f32.mrb[2].mxu0 }
  0xdb   :  { %v136_v17 = vadd.f32 %v135_v16, %v36_v15  ;;  %v279_v18 = vpop.f32.mrb[3].mxu0 }
  0xdd   :  { %v145_v20 = vmax.f32 %v136_v17, 0.0 }
  0xde   :  { %v140_v22 = vpop.f32.mrb[4].mxu0 }
  0xdf   :  { %v141_v23 = vadd.f32 %v140_v22, %v41_v21  ;;  %v282_v24 = vpop.f32.mrb[5].mxu0  ;;  %v293_v25 = vpack.c.bf16 %v145_v20, %v144_v19 }
  0xe1   :  { %v146_v26 = vmax.f32 %v141_v23, 0.0  ;;  %294 = vmatpush3.bf16.msra.mxu1 %v293_v25 }
  0xe2   :  { %287 = vmatprep.subr.mxu1 %v330_v2 }
  0xe5   :  { %288 = vmatpush3.msk.msra.mxu1 %vm151_vm3, %v146_v26 }
  0xe6   :  { %290 = vmatmul.mubr.msk.f32.vlgmr.msra.gmra.mrb[0].mxu1 %vm147_vm4, %v24_v27 }
 0x1b9   :  { %v221_v29 = vpop.f32.mrb[0].mxu1 }
 0x1ba   :  { %v222_v30 = vadd.f32 %v221_v29, %v47_v28  ;;  %v291_v31 = vpop.f32.mrb[1].mxu1 }
 0x1bc   :  { %v226_v32 = vrot.slane %v222_v30, 1 }
 0x1be   :  { %v229_v33 = vsub.f32 %v222_v30, %v226_v32  ;;  %v228_v42 = vmax.f32 %v222_v30, %v226_v32 }
 0x1c0   :  { %v230_v34 = vand.u32 2147483647, %v229_v33 }
 0x1c2   :  { %v231_v35 = vsub.f32 0.0, %v230_v34 }
 0x1c4   :  { %v232_v36 = vmul.f32 1.442695, %v231_v35 }
 0x1c6   :  { %302 = vpow2.f32 %v232_v36 }
 0x1d0   :  { %v303_v37 = vpop.eup %302 }
 0x1d1   :  { %v234_v38 = vadd.f32 1.0, %v303_v37 }
 0x1d3   :  { %304 = vlog2.f32 %v234_v38 }
 0x1dd   :  { %v305_v41 = vpop.eup %304 }
 0x1de   :  { %v236_v43 = vmul.f32 0.6931472, %v305_v41 }
 0x1e0   :  { %v237_v45 = vadd.f32 %v236_v43, %v228_v42 }
 0x1e2   :  { %v241_v46 = vrot.slane %v237_v45, %v240_v44 }
 0x1e4   :  { %v242_v47 = vsub.f32 %v222_v30, %v241_v46 }
 0x1e6   :  { %243 = vst [vmem:[#allocation2] sm:$0x3] %v242_v47 }
 0x1e7   :  { %317 = shalt.err (!%p314_p4)
}
 0x1e8   :  { %s318_s11 = scalar_lea.hbm %s416_s5, 32 }
 0x1e9   :  { %p319_p5 = scmp.ne.s32.totalorder %s416_s5, %s318_s11  ;;  %p322_p6 = scmp.lt.u32.totalorder %s318_s11, %s416_s5 }
 0x1eb   :  { %p324_p7 = pnand %p322_p6, %p319_p5 }
 0x1ed   :  { %327 = shalt.err (!%p324_p7)
}
 0x1ee   :  { %253 = dma.vmem_to_hbm [thread:$0]  %s251_s4, 32, %s416_s5, [#allocation3]  }
 0x1ef   :  { %328 = dma.done.wait [#allocation3], 32  }
 0x1f0   :  { %329 = vsyncadd [#allocation3], 4294967264 }
 0x1f1   :  { %257 = vsyncpa [#allocation3], 1 }

</bundles_post_ra>
